<compile_context>
chip_gen: v7x
topology: tpu7x:2x2x1
jax: 0.10.0
libtpu: 0.0.40
codegen_flags: <defaults>
</compile_context>

<pallas_src>
import jax
import jax.numpy as jnp
import numpy as np
from jax.experimental import pallas as pl
from jax.experimental.pallas import tpu as pltpu

_LANE = 128
_SUBLANE = 8


# ----------------------------- tiling helpers -----------------------------

def _round_up(v, m):
    return -(-v // m) * m


def _vmem_config():
    """Generation-aware (tile_budget_bytes, vmem_limit_bytes)."""
    try:
        cap = int(pltpu.get_tpu_info().vmem_capacity_bytes)
    except Exception:
        cap = 0
    if cap >= 100 * 1024 * 1024:           # 128 MiB parts (v5e / v6e)
        limit = 96 * 1024 * 1024
    else:                                   # v7x (64 MiB / TC) or unknown -> safe
        limit = 48 * 1024 * 1024
    return (limit * 3) // 4, limit


def _choose_tile(extent, per_unit_bytes, resident_bytes, budget, batch,
                 granule, max_units):
    """Largest pixel tile (in `granule` units) fitting the VMEM budget after the
    resident (weight) buffers.  Ragged last blocks are handled by Pallas masking
    so no padding is ever materialized in HBM."""
    budget = max(budget - resident_bytes, 2 * 1024 * 1024)
    cap = max(granule, (budget // max(per_unit_bytes, 1)) // granule * granule)
    cap = min(cap, max_units)
    tile = extent if extent <= cap else cap
    # v7x shards the "parallel" grid axes across 2 TensorCores: make sure the
    # grid has >= 2 steps whenever the problem is big enough to split.
    if batch == 1 and tile >= extent and extent >= 2 * granule:
        tile = _round_up(-(-extent // 2), granule)
    return tile


# ----------------------------- kernel bodies -----------------------------

def _make_kernel_smallc(c, cf):
    """VPU path for tiny channel counts (C < 8).

    Ref shapes (batch squeezed by the BlockSpec):
      x_ref : (C, S, 128)   f_ref : (cf, S, 128)
      w1_ref: (C, C)  SMEM  w2_ref: (C, cf) SMEM   o_ref: (C, S, 128)
    The minor (S, 128) tile fills whole vregs; 1x1 convs are unrolled
    scalar*vector FMAs (no MXU push/pop for a tiny contraction).
    """
    def kernel(x_ref, f_ref, w1_ref, w2_ref, o_ref):
        x = x_ref[...].astype(jnp.float32)
        f = f_ref[...].astype(jnp.float32)
        for o in range(c):
            pre = w1_ref[o, 0] * x[0]
            for i in range(1, c):
                pre = pre + w1_ref[o, i] * x[i]
            for i in range(cf):
                pre = pre + w2_ref[o, i] * f[i]
            o_ref[o] = (x[o] + jax.nn.sigmoid(pre)).astype(o_ref.dtype)
    return kernel


def _make_kernel_mxu(dedup):
    """MXU path.  Ref shapes:
      x_ref: (C, TN)   f_ref: (1 or C, TN)   w1_ref: (C, C)
      w2_ref: (C, 1) rowsum(w2) if dedup else (C, C)     o_ref: (C, TN)
    Operands stay in their I/O dtype (bf16 runs at native MXU rate);
    accumulation is f32 via preferred_element_type.
    """
    def kernel(x_ref, f_ref, w1_ref, w2_ref, o_ref):
        x = x_ref[...]
        f = f_ref[...]
        pre = jnp.dot(w1_ref[...], x, preferred_element_type=jnp.float32)
        if dedup:
            # conv_2(channel-broadcast f) == rowsum(w2)[:, None] * f
            pre = pre + w2_ref[...].astype(jnp.float32) * f.astype(jnp.float32)
        else:
            pre = pre + jnp.dot(w2_ref[...], f, preferred_element_type=jnp.float32)
        o_ref[...] = (x.astype(jnp.float32) + jax.nn.sigmoid(pre)).astype(o_ref.dtype)
    return kernel


# ----------------------------- pallas_call wrappers -----------------------------

def _attention_pallas_smallc(x4, f4, w1, w2, out_dtype, fb):
    """x4: (B, C, St, 128), f4: (fb, cf, St, 128), weights f32 (go to SMEM)."""
    B, C, St, L = x4.shape
    CF = f4.shape[1]
    in_item = jnp.dtype(x4.dtype).itemsize
    out_item = jnp.dtype(out_dtype).itemsize
    budget, vmem_limit = _vmem_config()
    per_sub = 2 * L * (C * in_item + CF * in_item + C * out_item)   # dbl-buffered
    s_tile = _choose_tile(St, per_sub, 0, budget, B, _SUBLANE, 256)
    s_tiles = pl.cdiv(St, s_tile)

    batch_inner = (fb == 1 and B > 1)   # keep the f block resident across batch
    if batch_inner:
        grid = (s_tiles, B)
        x_idx = lambda s, b: (b, 0, s, 0)
        f_idx = lambda s, b: (0, 0, s, 0)
        o_idx = lambda s, b: (b, 0, s, 0)
    else:
        grid = (B, s_tiles)
        x_idx = lambda b, s: (b, 0, s, 0)
        f_idx = (lambda b, s: (0, 0, s, 0)) if fb == 1 else (lambda b, s: (b, 0, s, 0))
        o_idx = lambda b, s: (b, 0, s, 0)

    return pl.pallas_call(
        _make_kernel_smallc(C, CF),
        out_shape=jax.ShapeDtypeStruct((B, C, St, L), out_dtype),
        grid_spec=pltpu.PrefetchScalarGridSpec(
            num_scalar_prefetch=0,
            grid=grid,
            in_specs=[
                pl.BlockSpec((None, C, s_tile, L), x_idx),
                pl.BlockSpec((None, CF, s_tile, L), f_idx),
                pl.BlockSpec(memory_space=pltpu.MemorySpace.SMEM),
                pl.BlockSpec(memory_space=pltpu.MemorySpace.SMEM),
            ],
            out_specs=pl.BlockSpec((None, C, s_tile, L), o_idx),
        ),
        compiler_params=pltpu.CompilerParams(
            dimension_semantics=("parallel", "parallel"),
            vmem_limit_bytes=vmem_limit,
        ),
    )(x4, f4, w1, w2)


def _attention_pallas_mxu(x_bcn, f_bcn, w1, w2, out_dtype, fb, dedup):
    """x_bcn: (B, C, N), f_bcn: (fb, 1 or C, N), w1: (C, C), w2: (C, 1|C)."""
    B, C, N = x_bcn.shape
    CF = f_bcn.shape[1]
    in_item = jnp.dtype(x_bcn.dtype).itemsize
    out_item = jnp.dtype(out_dtype).itemsize
    w_item = jnp.dtype(w1.dtype).itemsize
    budget, vmem_limit = _vmem_config()
    resident = 2 * (w1.size + w2.size) * w_item     # double-buffered weight blocks
    per_lane = 2 * (C * in_item + CF * in_item + C * out_item)
    tile_n = _choose_tile(N, per_lane, resident, budget, B, _LANE, 32768)
    n_tiles = pl.cdiv(N, tile_n)

    batch_inner = (fb == 1 and B > 1)   # batch fastest -> f block fetched once/tile
    if batch_inner:
        grid = (n_tiles, B)
        x_idx = lambda i, b: (b, 0, i)
        f_idx = lambda i, b: (0, 0, i)
        o_idx = lambda i, b: (b, 0, i)
    else:
        grid = (B, n_tiles)
        x_idx = lambda b, i: (b, 0, i)
        f_idx = (lambda b, i: (0, 0, i)) if fb == 1 else (lambda b, i: (b, 0, i))
        o_idx = lambda b, i: (b, 0, i)
    w_idx = lambda a, b: (0, 0)

    return pl.pallas_call(
        _make_kernel_mxu(dedup),
        out_shape=jax.ShapeDtypeStruct((B, C, N), out_dtype),
        grid_spec=pltpu.PrefetchScalarGridSpec(
            num_scalar_prefetch=0,
            grid=grid,
            in_specs=[
                pl.BlockSpec((None, C, tile_n), x_idx),
                pl.BlockSpec((None, CF, tile_n), f_idx),
                pl.BlockSpec((C, C), w_idx),
                pl.BlockSpec(w2.shape, w_idx),
            ],
            out_specs=pl.BlockSpec((None, C, tile_n), o_idx),
        ),
        compiler_params=pltpu.CompilerParams(
            dimension_semantics=("parallel", "parallel"),
            vmem_limit_bytes=vmem_limit,
        ),
    )(x_bcn, f_bcn, w1, w2)


# ----------------------------- glue (plain JAX) -----------------------------

def _bilinear_axis(out_size, in_size):
    # PyTorch interpolate(mode='bilinear', align_corners=False) coordinate map.
    scale = in_size / out_size
    coords = (jnp.arange(out_size, dtype=jnp.float32) + 0.5) * scale - 0.5
    coords = jnp.clip(coords, 0.0, in_size - 1)
    lo = jnp.floor(coords).astype(jnp.int32)
    hi = jnp.minimum(lo + 1, in_size - 1)
    frac = coords - lo.astype(jnp.float32)
    return lo, hi, frac


def bilinear_resize_nchw(f, h, w):
    """f: (B, C, Hin, Win) -> (B, C, h, w), matching torch align_corners=False."""
    _, _, hin, win = f.shape
    ylo, yhi, yfrac = _bilinear_axis(h, hin)
    xlo, xhi, xfrac = _bilinear_axis(w, win)
    top = f[:, :, ylo, :]
    bot = f[:, :, yhi, :]
    rows = top + yfrac[None, None, :, None] * (bot - top)
    left = rows[:, :, :, xlo]
    right = rows[:, :, :, xhi]
    return left + xfrac[None, None, None, :] * (right - left)


def attention_forward(x, f_l, w1, w2, *, io_dtype=None):
    """x: (B, C, H, W).  f_l: (fb, fc, Hf, Wf), fb in {1, B}, fc in {1, C}.
    w1/w2: (C, C) 1x1-conv weights.  (The torch module draws fresh random conv
    weights inside forward; we pass them explicitly for determinism.)"""
    b, c, h, w = x.shape
    io_dtype = jnp.dtype(x.dtype if io_dtype is None else io_dtype)
    n = h * w

    # TODO(synk): the bilinear resize could be fused into the kernel (prefetch
    # lo/hi/frac tables, lerp on the VPU from the low-res f_l tile) to avoid
    # writing f_up to HBM; kept as plain JAX here.
    f_up = bilinear_resize_nchw(f_l, h, w)              # (fb, fc, h, w)
    fb, fc = int(f_up.shape[0]), int(f_up.shape[1])
    if fb not in (1, b) or fc not in (1, c):
        raise ValueError("f_l must be expandable to x's shape")
    dedup = (fc == 1)   # conv_2(channel-broadcast f) == rowsum(w2)[:, None] * f

    x_bcn = x.reshape(b, c, n).astype(io_dtype)          # free reshape, no copy
    f_bcn = f_up.reshape(fb, fc, n).astype(io_dtype)     # broadcast via index_map
    w2_in = jnp.sum(w2, axis=1, keepdims=True) if dedup else w2

    if c < _SUBLANE and n % _LANE == 0:
        # Tiny C wastes sublanes in a (C, N) layout: reshape the pixel axis
        # (free, contiguous) so the minor block dims are full (S, 128) vregs.
        out = _attention_pallas_smallc(
            x_bcn.reshape(b, c, n // _LANE, _LANE),
            f_bcn.reshape(fb, f_bcn.shape[1], n // _LANE, _LANE),
            w1.astype(jnp.float32), w2_in.astype(jnp.float32),
            io_dtype, fb)
    else:
        wdt = io_dtype if io_dtype == jnp.dtype(jnp.bfloat16) else jnp.float32
        out = _attention_pallas_mxu(
            x_bcn, f_bcn,
            w1.astype(wdt),
            w2_in.astype(jnp.float32) if dedup else w2_in.astype(wdt),
            io_dtype, fb, dedup)
    return out.reshape(b, c, h, w)


attention_forward_jit = jax.jit(attention_forward, static_argnames=("io_dtype",))


# ----------------------------- main -----------------------------

if __name__ == "__main__":
    keys = jax.random.split(jax.random.PRNGKey(0), 8)

    def ref_fn(x_, f_bchw, w1_, w2_):
        pre = (jnp.einsum('oc,bchw->bohw', w1_, x_)
               + jnp.einsum('oc,bchw->bohw', w2_, f_bchw))
        return x_ + jax.nn.sigmoid(pre)

    def torch_like_init(k, c):
        # Conv2d(c, c, 1, bias=False) default init: uniform(+-1/sqrt(fan_in))
        bound = 1.0 / np.sqrt(c)
        return jax.random.uniform(k, (c, c), jnp.float32, -bound, bound)

    B, C, H, W, Hf, Wf = 2, 4, 16, 16, 8, 8
    x = jax.random.normal(keys[0], (B, C, H, W), jnp.float32)
    f_l = jax.random.normal(keys[1], (1, 1, Hf, Wf), jnp.float32)
    w1 = torch_like_init(keys[2], C)
    w2 = torch_like_init(keys[3], C)
    f_up_b = jnp.broadcast_to(bilinear_resize_nchw(f_l, H, W), (B, C, H, W))

    # 1) f32 I/O, channel-broadcast f (dedup), small-C VPU path
    out = jax.block_until_ready(attention_forward_jit(x, f_l, w1, w2))
    np.testing.assert_allclose(np.asarray(out),
                               np.asarray(ref_fn(x, f_up_b, w1, w2)),
                               rtol=1e-5, atol=1e-5)

    # 2) bf16 I/O (halves HBM traffic; compute stays f32 inside the kernel)
    out_bf = jax.block_until_ready(
        attention_forward_jit(x, f_l, w1, w2, io_dtype=jnp.bfloat16))
    x_r = x.astype(jnp.bfloat16).astype(jnp.float32)
    f_r = f_up_b.astype(jnp.bfloat16).astype(jnp.float32)
    np.testing.assert_allclose(np.asarray(out_bf.astype(jnp.float32)),
                               np.asarray(ref_fn(x_r, f_r, w1, w2)),
                               rtol=2e-2, atol=2e-2)

    # 3) general path: f_l with full batch/channel dims (no dedup shortcut)
    f_full = jax.random.normal(keys[4], (B, C, Hf, Wf), jnp.float32)
    out_g = jax.block_until_ready(attention_forward_jit(x, f_full, w1, w2))
    np.testing.assert_allclose(
        np.asarray(out_g),
        np.asarray(ref_fn(x, bilinear_resize_nchw(f_full, H, W), w1, w2)),
        rtol=1e-5, atol=1e-5)

    # 4) C=64 -> MXU path, dedup.  (Looser tol: MXU f32 matmul accumulation
    #    order / multi-pass decomposition differs slightly from XLA's einsum.)
    C2 = 64
    x2 = jax.random.normal(keys[5], (B, C2, H, W), jnp.float32)
    w1b = torch_like_init(keys[6], C2)
    w2b = torch_like_init(keys[7], C2)
    out2 = jax.block_until_ready(attention_forward_jit(x2, f_l, w1b, w2b))
    f_up2 = jnp.broadcast_to(bilinear_resize_nchw(f_l, H, W), (B, C2, H, W))
    np.testing.assert_allclose(np.asarray(out2),
                               np.asarray(ref_fn(x2, f_up2, w1b, w2b)),
                               rtol=5e-3, atol=5e-3)

    # 5) C=64, batch-broadcast full-channel f -> general MXU path, batch-inner grid
    f_c = jax.random.normal(keys[4], (1, C2, Hf, Wf), jnp.float32)
    out3 = jax.block_until_ready(attention_forward_jit(x2, f_c, w1b, w2b))
    f_c_up = jnp.broadcast_to(bilinear_resize_nchw(f_c, H, W), (B, C2, H, W))
    np.testing.assert_allclose(np.asarray(out3),
                               np.asarray(ref_fn(x2, f_c_up, w1b, w2b)),
                               rtol=5e-3, atol=5e-3)

    print("KERNEL_OK")
</pallas_src>

<mosaic_0001>
module attributes {stable_mosaic.version = 11 : i64} {
  func.func @kernel(%arg0: i32, %arg1: i32, %arg2: memref<1x4x2x128xf32, #tpu.memory_space<vmem>>, %arg3: memref<1x1x2x128xf32, #tpu.memory_space<vmem>>, %arg4: memref<4x4xf32, #tpu.memory_space<smem>>, %arg5: memref<4x1xf32, #tpu.memory_space<smem>>, %arg6: memref<1x4x2x128xf32, #tpu.memory_space<vmem>>) attributes {dimension_semantics = [#tpu.dimension_semantics<parallel>, #tpu.dimension_semantics<parallel>], iteration_bounds = array<i64: 1, 2>, scalar_prefetch = 0 : i64, scratch_operands = 0 : i64, tpu.core_type = #tpu.core_type<tc>, window_params = [{transform_indices = @transform_0, window_bounds = array<i64: 1, 4, 2, 128>}, {transform_indices = @transform_1, window_bounds = array<i64: 1, 1, 2, 128>}, {transform_indices = @transform_2, window_bounds = array<i64: 4, 4>}, {transform_indices = @transform_3, window_bounds = array<i64: 4, 1>}, {transform_indices = @transform_4, window_bounds = array<i64: 1, 4, 2, 128>}]} {
    %c0 = arith.constant 0 : index
    %c0_0 = arith.constant 0 : index
    %c0_1 = arith.constant 0 : index
    %c0_2 = arith.constant 0 : index
    %0 = vector.load %arg2[%c0, %c0_0, %c0_1, %c0_2] : memref<1x4x2x128xf32, #tpu.memory_space<vmem>>, vector<1x4x2x128xf32>
    %1 = vector.shape_cast %0 : vector<1x4x2x128xf32> to vector<4x2x128xf32>
    %c0_3 = arith.constant 0 : index
    %c0_4 = arith.constant 0 : index
    %c0_5 = arith.constant 0 : index
    %c0_6 = arith.constant 0 : index
    %2 = vector.load %arg3[%c0_3, %c0_4, %c0_5, %c0_6] : memref<1x1x2x128xf32, #tpu.memory_space<vmem>>, vector<1x1x2x128xf32>
    %3 = vector.shape_cast %2 : vector<1x1x2x128xf32> to vector<1x2x128xf32>
    %c0_7 = arith.constant 0 : index
    %c0_8 = arith.constant 0 : index
    %4 = memref.load %arg4[%c0_7, %c0_8] : memref<4x4xf32, #tpu.memory_space<smem>>
    %5 = vector.extract_strided_slice %1 {offsets = [0, 0, 0], sizes = [1, 2, 128], strides = [1, 1, 1]} : vector<4x2x128xf32> to vector<1x2x128xf32>
    %6 = vector.shape_cast %5 : vector<1x2x128xf32> to vector<2x128xf32>
    %7 = vector.broadcast %4 : f32 to vector<2x128xf32>
    %8 = arith.mulf %7, %6 : vector<2x128xf32>
    %c0_9 = arith.constant 0 : index
    %c1 = arith.constant 1 : index
    %9 = memref.load %arg4[%c0_9, %c1] : memref<4x4xf32, #tpu.memory_space<smem>>
    %10 = vector.extract_strided_slice %1 {offsets = [1, 0, 0], sizes = [1, 2, 128], strides = [1, 1, 1]} : vector<4x2x128xf32> to vector<1x2x128xf32>
    %11 = vector.shape_cast %10 : vector<1x2x128xf32> to vector<2x128xf32>
    %12 = vector.broadcast %9 : f32 to vector<2x128xf32>
    %13 = arith.mulf %12, %11 : vector<2x128xf32>
    %14 = arith.addf %8, %13 : vector<2x128xf32>
    %c0_10 = arith.constant 0 : index
    %c2 = arith.constant 2 : index
    %15 = memref.load %arg4[%c0_10, %c2] : memref<4x4xf32, #tpu.memory_space<smem>>
    %16 = vector.extract_strided_slice %1 {offsets = [2, 0, 0], sizes = [1, 2, 128], strides = [1, 1, 1]} : vector<4x2x128xf32> to vector<1x2x128xf32>
    %17 = vector.shape_cast %16 : vector<1x2x128xf32> to vector<2x128xf32>
    %18 = vector.broadcast %15 : f32 to vector<2x128xf32>
    %19 = arith.mulf %18, %17 : vector<2x128xf32>
    %20 = arith.addf %14, %19 : vector<2x128xf32>
    %c0_11 = arith.constant 0 : index
    %c3 = arith.constant 3 : index
    %21 = memref.load %arg4[%c0_11, %c3] : memref<4x4xf32, #tpu.memory_space<smem>>
    %22 = vector.extract_strided_slice %1 {offsets = [3, 0, 0], sizes = [1, 2, 128], strides = [1, 1, 1]} : vector<4x2x128xf32> to vector<1x2x128xf32>
    %23 = vector.shape_cast %22 : vector<1x2x128xf32> to vector<2x128xf32>
    %24 = vector.broadcast %21 : f32 to vector<2x128xf32>
    %25 = arith.mulf %24, %23 : vector<2x128xf32>
    %26 = arith.addf %20, %25 : vector<2x128xf32>
    %c0_12 = arith.constant 0 : index
    %c0_13 = arith.constant 0 : index
    %27 = memref.load %arg5[%c0_12, %c0_13] : memref<4x1xf32, #tpu.memory_space<smem>>
    %28 = vector.shape_cast %3 : vector<1x2x128xf32> to vector<2x128xf32>
    %29 = vector.broadcast %27 : f32 to vector<2x128xf32>
    %30 = arith.mulf %29, %28 : vector<2x128xf32>
    %31 = arith.addf %26, %30 : vector<2x128xf32>
    %32 = vector.extract_strided_slice %1 {offsets = [0, 0, 0], sizes = [1, 2, 128], strides = [1, 1, 1]} : vector<4x2x128xf32> to vector<1x2x128xf32>
    %33 = vector.shape_cast %32 : vector<1x2x128xf32> to vector<2x128xf32>
    %34 = arith.negf %31 : vector<2x128xf32>
    %35 = math.exp %34 : vector<2x128xf32>
    %cst = arith.constant 1.000000e+00 : f32
    %36 = vector.broadcast %cst : f32 to vector<2x128xf32>
    %37 = arith.addf %36, %35 : vector<2x128xf32>
    %38 = arith.divf %36, %37 : vector<2x128xf32>
    %39 = arith.addf %33, %38 : vector<2x128xf32>
    %c0_14 = arith.constant 0 : index
    %c0_15 = arith.constant 0 : index
    %c0_16 = arith.constant 0 : index
    %c0_17 = arith.constant 0 : index
    %40 = vector.load %arg6[%c0_14, %c0_15, %c0_16, %c0_17] : memref<1x4x2x128xf32, #tpu.memory_space<vmem>>, vector<1x1x2x128xf32>
    %41 = vector.shape_cast %40 : vector<1x1x2x128xf32> to vector<2x128xf32>
    %42 = vector.shape_cast %39 : vector<2x128xf32> to vector<1x1x2x128xf32>
    tpu.vector_store %arg6[%c0_14, %c0_15, %c0_16, %c0_17], %42 {strides = array<i32>} : memref<1x4x2x128xf32, #tpu.memory_space<vmem>>, vector<1x1x2x128xf32>,
    %c1_18 = arith.constant 1 : index
    %c0_19 = arith.constant 0 : index
    %43 = memref.load %arg4[%c1_18, %c0_19] : memref<4x4xf32, #tpu.memory_space<smem>>
    %44 = vector.extract_strided_slice %1 {offsets = [0, 0, 0], sizes = [1, 2, 128], strides = [1, 1, 1]} : vector<4x2x128xf32> to vector<1x2x128xf32>
    %45 = vector.shape_cast %44 : vector<1x2x128xf32> to vector<2x128xf32>
    %46 = vector.broadcast %43 : f32 to vector<2x128xf32>
    %47 = arith.mulf %46, %45 : vector<2x128xf32>
    %c1_20 = arith.constant 1 : index
    %c1_21 = arith.constant 1 : index
    %48 = memref.load %arg4[%c1_20, %c1_21] : memref<4x4xf32, #tpu.memory_space<smem>>
    %49 = vector.extract_strided_slice %1 {offsets = [1, 0, 0], sizes = [1, 2, 128], strides = [1, 1, 1]} : vector<4x2x128xf32> to vector<1x2x128xf32>
    %50 = vector.shape_cast %49 : vector<1x2x128xf32> to vector<2x128xf32>
    %51 = vector.broadcast %48 : f32 to vector<2x128xf32>
    %52 = arith.mulf %51, %50 : vector<2x128xf32>
    %53 = arith.addf %47, %52 : vector<2x128xf32>
    %c1_22 = arith.constant 1 : index
    %c2_23 = arith.constant 2 : index
    %54 = memref.load %arg4[%c1_22, %c2_23] : memref<4x4xf32, #tpu.memory_space<smem>>
    %55 = vector.extract_strided_slice %1 {offsets = [2, 0, 0], sizes = [1, 2, 128], strides = [1, 1, 1]} : vector<4x2x128xf32> to vector<1x2x128xf32>
    %56 = vector.shape_cast %55 : vector<1x2x128xf32> to vector<2x128xf32>
    %57 = vector.broadcast %54 : f32 to vector<2x128xf32>
    %58 = arith.mulf %57, %56 : vector<2x128xf32>
    %59 = arith.addf %53, %58 : vector<2x128xf32>
    %c1_24 = arith.constant 1 : index
    %c3_25 = arith.constant 3 : index
    %60 = memref.load %arg4[%c1_24, %c3_25] : memref<4x4xf32, #tpu.memory_space<smem>>
    %61 = vector.extract_strided_slice %1 {offsets = [3, 0, 0], sizes = [1, 2, 128], strides = [1, 1, 1]} : vector<4x2x128xf32> to vector<1x2x128xf32>
    %62 = vector.shape_cast %61 : vector<1x2x128xf32> to vector<2x128xf32>
    %63 = vector.broadcast %60 : f32 to vector<2x128xf32>
    %64 = arith.mulf %63, %62 : vector<2x128xf32>
    %65 = arith.addf %59, %64 : vector<2x128xf32>
    %c1_26 = arith.constant 1 : index
    %c0_27 = arith.constant 0 : index
    %66 = memref.load %arg5[%c1_26, %c0_27] : memref<4x1xf32, #tpu.memory_space<smem>>
    %67 = vector.shape_cast %3 : vector<1x2x128xf32> to vector<2x128xf32>
    %68 = vector.broadcast %66 : f32 to vector<2x128xf32>
    %69 = arith.mulf %68, %67 : vector<2x128xf32>
    %70 = arith.addf %65, %69 : vector<2x128xf32>
    %71 = vector.extract_strided_slice %1 {offsets = [1, 0, 0], sizes = [1, 2, 128], strides = [1, 1, 1]} : vector<4x2x128xf32> to vector<1x2x128xf32>
    %72 = vector.shape_cast %71 : vector<1x2x128xf32> to vector<2x128xf32>
    %73 = arith.negf %70 : vector<2x128xf32>
    %74 = math.exp %73 : vector<2x128xf32>
    %cst_28 = arith.constant 1.000000e+00 : f32
    %75 = vector.broadcast %cst_28 : f32 to vector<2x128xf32>
    %76 = arith.addf %75, %74 : vector<2x128xf32>
    %77 = arith.divf %75, %76 : vector<2x128xf32>
    %78 = arith.addf %72, %77 : vector<2x128xf32>
    %c0_29 = arith.constant 0 : index
    %c1_30 = arith.constant 1 : index
    %c0_31 = arith.constant 0 : index
    %c0_32 = arith.constant 0 : index
    %79 = vector.load %arg6[%c0_29, %c1_30, %c0_31, %c0_32] : memref<1x4x2x128xf32, #tpu.memory_space<vmem>>, vector<1x1x2x128xf32>
    %80 = vector.shape_cast %79 : vector<1x1x2x128xf32> to vector<2x128xf32>
    %81 = vector.shape_cast %78 : vector<2x128xf32> to vector<1x1x2x128xf32>
    tpu.vector_store %arg6[%c0_29, %c1_30, %c0_31, %c0_32], %81 {strides = array<i32>} : memref<1x4x2x128xf32, #tpu.memory_space<vmem>>, vector<1x1x2x128xf32>,
    %c2_33 = arith.constant 2 : index
    %c0_34 = arith.constant 0 : index
    %82 = memref.load %arg4[%c2_33, %c0_34] : memref<4x4xf32, #tpu.memory_space<smem>>
    %83 = vector.extract_strided_slice %1 {offsets = [0, 0, 0], sizes = [1, 2, 128], strides = [1, 1, 1]} : vector<4x2x128xf32> to vector<1x2x128xf32>
    %84 = vector.shape_cast %83 : vector<1x2x128xf32> to vector<2x128xf32>
    %85 = vector.broadcast %82 : f32 to vector<2x128xf32>
    %86 = arith.mulf %85, %84 : vector<2x128xf32>
    %c2_35 = arith.constant 2 : index
    %c1_36 = arith.constant 1 : index
    %87 = memref.load %arg4[%c2_35, %c1_36] : memref<4x4xf32, #tpu.memory_space<smem>>
    %88 = vector.extract_strided_slice %1 {offsets = [1, 0, 0], sizes = [1, 2, 128], strides = [1, 1, 1]} : vector<4x2x128xf32> to vector<1x2x128xf32>
    %89 = vector.shape_cast %88 : vector<1x2x128xf32> to vector<2x128xf32>
    %90 = vector.broadcast %87 : f32 to vector<2x128xf32>
    %91 = arith.mulf %90, %89 : vector<2x128xf32>
    %92 = arith.addf %86, %91 : vector<2x128xf32>
    %c2_37 = arith.constant 2 : index
    %c2_38 = arith.constant 2 : index
    %93 = memref.load %arg4[%c2_37, %c2_38] : memref<4x4xf32, #tpu.memory_space<smem>>
    %94 = vector.extract_strided_slice %1 {offsets = [2, 0, 0], sizes = [1, 2, 128], strides = [1, 1, 1]} : vector<4x2x128xf32> to vector<1x2x128xf32>
    %95 = vector.shape_cast %94 : vector<1x2x128xf32> to vector<2x128xf32>
    %96 = vector.broadcast %93 : f32 to vector<2x128xf32>
    %97 = arith.mulf %96, %95 : vector<2x128xf32>
    %98 = arith.addf %92, %97 : vector<2x128xf32>
    %c2_39 = arith.constant 2 : index
    %c3_40 = arith.constant 3 : index
    %99 = memref.load %arg4[%c2_39, %c3_40] : memref<4x4xf32, #tpu.memory_space<smem>>
    %100 = vector.extract_strided_slice %1 {offsets = [3, 0, 0], sizes = [1, 2, 128], strides = [1, 1, 1]} : vector<4x2x128xf32> to vector<1x2x128xf32>
    %101 = vector.shape_cast %100 : vector<1x2x128xf32> to vector<2x128xf32>
    %102 = vector.broadcast %99 : f32 to vector<2x128xf32>
    %103 = arith.mulf %102, %101 : vector<2x128xf32>
    %104 = arith.addf %98, %103 : vector<2x128xf32>
    %c2_41 = arith.constant 2 : index
    %c0_42 = arith.constant 0 : index
    %105 = memref.load %arg5[%c2_41, %c0_42] : memref<4x1xf32, #tpu.memory_space<smem>>
    %106 = vector.shape_cast %3 : vector<1x2x128xf32> to vector<2x128xf32>
    %107 = vector.broadcast %105 : f32 to vector<2x128xf32>
    %108 = arith.mulf %107, %106 : vector<2x128xf32>
    %109 = arith.addf %104, %108 : vector<2x128xf32>
    %110 = vector.extract_strided_slice %1 {offsets = [2, 0, 0], sizes = [1, 2, 128], strides = [1, 1, 1]} : vector<4x2x128xf32> to vector<1x2x128xf32>
    %111 = vector.shape_cast %110 : vector<1x2x128xf32> to vector<2x128xf32>
    %112 = arith.negf %109 : vector<2x128xf32>
    %113 = math.exp %112 : vector<2x128xf32>
    %cst_43 = arith.constant 1.000000e+00 : f32
    %114 = vector.broadcast %cst_43 : f32 to vector<2x128xf32>
    %115 = arith.addf %114, %113 : vector<2x128xf32>
    %116 = arith.divf %114, %115 : vector<2x128xf32>
    %117 = arith.addf %111, %116 : vector<2x128xf32>
    %c0_44 = arith.constant 0 : index
    %c2_45 = arith.constant 2 : index
    %c0_46 = arith.constant 0 : index
    %c0_47 = arith.constant 0 : index
    %118 = vector.load %arg6[%c0_44, %c2_45, %c0_46, %c0_47] : memref<1x4x2x128xf32, #tpu.memory_space<vmem>>, vector<1x1x2x128xf32>
    %119 = vector.shape_cast %118 : vector<1x1x2x128xf32> to vector<2x128xf32>
    %120 = vector.shape_cast %117 : vector<2x128xf32> to vector<1x1x2x128xf32>
    tpu.vector_store %arg6[%c0_44, %c2_45, %c0_46, %c0_47], %120 {strides = array<i32>} : memref<1x4x2x128xf32, #tpu.memory_space<vmem>>, vector<1x1x2x128xf32>,
    %c3_48 = arith.constant 3 : index
    %c0_49 = arith.constant 0 : index
    %121 = memref.load %arg4[%c3_48, %c0_49] : memref<4x4xf32, #tpu.memory_space<smem>>
    %122 = vector.extract_strided_slice %1 {offsets = [0, 0, 0], sizes = [1, 2, 128], strides = [1, 1, 1]} : vector<4x2x128xf32> to vector<1x2x128xf32>
    %123 = vector.shape_cast %122 : vector<1x2x128xf32> to vector<2x128xf32>
    %124 = vector.broadcast %121 : f32 to vector<2x128xf32>
    %125 = arith.mulf %124, %123 : vector<2x128xf32>
    %c3_50 = arith.constant 3 : index
    %c1_51 = arith.constant 1 : index
    %126 = memref.load %arg4[%c3_50, %c1_51] : memref<4x4xf32, #tpu.memory_space<smem>>
    %127 = vector.extract_strided_slice %1 {offsets = [1, 0, 0], sizes = [1, 2, 128], strides = [1, 1, 1]} : vector<4x2x128xf32> to vector<1x2x128xf32>
    %128 = vector.shape_cast %127 : vector<1x2x128xf32> to vector<2x128xf32>
    %129 = vector.broadcast %126 : f32 to vector<2x128xf32>
    %130 = arith.mulf %129, %128 : vector<2x128xf32>
    %131 = arith.addf %125, %130 : vector<2x128xf32>
    %c3_52 = arith.constant 3 : index
    %c2_53 = arith.constant 2 : index
    %132 = memref.load %arg4[%c3_52, %c2_53] : memref<4x4xf32, #tpu.memory_space<smem>>
    %133 = vector.extract_strided_slice %1 {offsets = [2, 0, 0], sizes = [1, 2, 128], strides = [1, 1, 1]} : vector<4x2x128xf32> to vector<1x2x128xf32>
    %134 = vector.shape_cast %133 : vector<1x2x128xf32> to vector<2x128xf32>
    %135 = vector.broadcast %132 : f32 to vector<2x128xf32>
    %136 = arith.mulf %135, %134 : vector<2x128xf32>
    %137 = arith.addf %131, %136 : vector<2x128xf32>
    %c3_54 = arith.constant 3 : index
    %c3_55 = arith.constant 3 : index
    %138 = memref.load %arg4[%c3_54, %c3_55] : memref<4x4xf32, #tpu.memory_space<smem>>
    %139 = vector.extract_strided_slice %1 {offsets = [3, 0, 0], sizes = [1, 2, 128], strides = [1, 1, 1]} : vector<4x2x128xf32> to vector<1x2x128xf32>
    %140 = vector.shape_cast %139 : vector<1x2x128xf32> to vector<2x128xf32>
    %141 = vector.broadcast %138 : f32 to vector<2x128xf32>
    %142 = arith.mulf %141, %140 : vector<2x128xf32>
    %143 = arith.addf %137, %142 : vector<2x128xf32>
    %c3_56 = arith.constant 3 : index
    %c0_57 = arith.constant 0 : index
    %144 = memref.load %arg5[%c3_56, %c0_57] : memref<4x1xf32, #tpu.memory_space<smem>>
    %145 = vector.shape_cast %3 : vector<1x2x128xf32> to vector<2x128xf32>
    %146 = vector.broadcast %144 : f32 to vector<2x128xf32>
    %147 = arith.mulf %146, %145 : vector<2x128xf32>
    %148 = arith.addf %143, %147 : vector<2x128xf32>
    %149 = vector.extract_strided_slice %1 {offsets = [3, 0, 0], sizes = [1, 2, 128], strides = [1, 1, 1]} : vector<4x2x128xf32> to vector<1x2x128xf32>
    %150 = vector.shape_cast %149 : vector<1x2x128xf32> to vector<2x128xf32>
    %151 = arith.negf %148 : vector<2x128xf32>
    %152 = math.exp %151 : vector<2x128xf32>
    %cst_58 = arith.constant 1.000000e+00 : f32
    %153 = vector.broadcast %cst_58 : f32 to vector<2x128xf32>
    %154 = arith.addf %153, %152 : vector<2x128xf32>
    %155 = arith.divf %153, %154 : vector<2x128xf32>
    %156 = arith.addf %150, %155 : vector<2x128xf32>
    %c0_59 = arith.constant 0 : index
    %c3_60 = arith.constant 3 : index
    %c0_61 = arith.constant 0 : index
    %c0_62 = arith.constant 0 : index
    %157 = vector.load %arg6[%c0_59, %c3_60, %c0_61, %c0_62] : memref<1x4x2x128xf32, #tpu.memory_space<vmem>>, vector<1x1x2x128xf32>
    %158 = vector.shape_cast %157 : vector<1x1x2x128xf32> to vector<2x128xf32>
    %159 = vector.shape_cast %156 : vector<2x128xf32> to vector<1x1x2x128xf32>
    tpu.vector_store %arg6[%c0_59, %c3_60, %c0_61, %c0_62], %159 {strides = array<i32>} : memref<1x4x2x128xf32, #tpu.memory_space<vmem>>, vector<1x1x2x128xf32>,
    return
  }
  func.func @transform_0(%arg0: i32, %arg1: i32) -> (i32, i32, i32, i32) {
    %c0_i32 = arith.constant 0 : i32
    %c0_i32_0 = arith.constant 0 : i32
    %c0_i32_1 = arith.constant 0 : i32
    return %arg1, %c0_i32, %arg0, %c0_i32_0 : i32, i32, i32, i32
  }
  func.func @transform_1(%arg0: i32, %arg1: i32) -> (i32, i32, i32, i32) {
    %c0_i32 = arith.constant 0 : i32
    %c0_i32_0 = arith.constant 0 : i32
    %c0_i32_1 = arith.constant 0 : i32
    %c0_i32_2 = arith.constant 0 : i32
    return %c0_i32, %c0_i32_0, %arg0, %c0_i32_1 : i32, i32, i32, i32
  }
  func.func @transform_2(%arg0: i32, %arg1: i32) -> (i32, i32) {
    %c0_i32 = arith.constant 0 : i32
    %c0_i32_0 = arith.constant 0 : i32
    %c0_i32_1 = arith.constant 0 : i32
    return %c0_i32, %c0_i32_0 : i32, i32
  }
  func.func @transform_3(%arg0: i32, %arg1: i32) -> (i32, i32) {
    %c0_i32 = arith.constant 0 : i32
    %c0_i32_0 = arith.constant 0 : i32
    %c0_i32_1 = arith.constant 0 : i32
    return %c0_i32, %c0_i32_0 : i32, i32
  }
  func.func @transform_4(%arg0: i32, %arg1: i32) -> (i32, i32, i32, i32) {
    %c0_i32 = arith.constant 0 : i32
    %c0_i32_0 = arith.constant 0 : i32
    %c0_i32_1 = arith.constant 0 : i32
    return %arg1, %c0_i32, %arg0, %c0_i32_0 : i32, i32, i32, i32
  }
}

</mosaic_0001>

<bundles_post_ra>
// kernel: attention_forward.1
= control target key start
LH: loop header
LB: loop body
LE: loop exit
PB: predicated region body
PF: predicated region fallthrough
CT: control target
= control target key end

     0   :  { %9 = vsyncpa [#allocation3], 0  ;;  %s847_s0 = inlined_call_operand.vmem [shape: f32[2,4,2,128], index: 0, kind: input, shape index: {}]   ;;  %s848_s1 = inlined_call_operand.vmem [shape: f32[1,1,2,128], index: 1, kind: input, shape index: {}]   ;;  %s849_s2 = inlined_call_operand.vmem [shape: f32[4,4], index: 2, kind: input, shape index: {}]   ;;  %s850_s3 = inlined_call_operand.vmem [shape: f32[4,1], index: 3, kind: input, shape index: {}]   ;;  %s851_s4 = inlined_call_operand.vmem [shape: f32[2,4,2,128], index: 4, kind: output, shape index: {}]  }
   0x1   :  { %10 = vsyncpa [#allocation5], 0  ;;  %s703_s15 = smov 0   ;;  %s705_s16 = smov 0  }
   0x2   :  { %s707_s17 = smov 0  }
   0x3 LB: > { %s510_s18 = sadd.s32 4294967295, %s674_s17   ;;  %s25_s19 = sadd.s32 1, %s670_s16  ;;  %s674_s17 = sphi %s707_s17, %s16_s17   ;;  %s670_s16 = sphi %s705_s16, %s861_s16   ;;  %s666_s15 = sphi %s703_s15, %s860_s15  }
   0x4   : > { %p26_p0 = scmp.ge.s32.totalorder %s25_s19, 2  ;;  %p512_p1 = scmp.ge.s32.totalorder %s674_s17, 1 }
   0x5   : > { %p157_p2 = scmp.lt.s32.totalorder %s674_s17, 3  ;;  %p728_p4 = scmp.eq.s32.totalorder %s510_s18, 0 }
   0x6   : > { %s863_s19 = smov (%p26_p0, %s25_s19), 0  ;;  %s177_s24 = sshll.u32 %s849_s2, 4  ;;  %s178_s24 = int_to_ptr.vmem [resolvable:$true] %s177_s24 }
   0x7   : > { %p724_p3 = pnand %p512_p1, %p157_p2  ;;  %s188_s27 = sshll.u32 %s850_s3, 4  ;;  %s189_s27 = int_to_ptr.vmem [resolvable:$true] %s188_s27 }
   0x8   : > { %s856_s21 = scalar_select %p728_p4, 1, 0 }
   0x9   : > { %s855_s20 = scalar_select %p724_p3, 1, 0 }
   0xa   : > { %p561_p5 = pneg %p724_p3  ;;  %s614_s29 = scalar_lea.vmem %s178_s24, 64 }
   0xb   : > { %p615_p7 = scmp.ne.s32.totalorder %s178_s24, %s614_s29  ;;  %p622_p11 = scmp.lt.s32.totalorder %s178_s24, %s178_s24 }
   0xc   : > { %p742_p6 = pnand %p728_p4, %p561_p5  ;;  %p623_p12 = scmp.lt.s32.totalorder %s614_s29, %s614_s29 }
   0xe   : > { %p616_p8 = pneg %p742_p6  ;;  %p624_p13 = por %p623_p12, %p622_p11 }
  0x10   : > { %p617_p9 = pnand %p616_p8, %p615_p7 }
  0x12   : > { %p618_p10 = pneg %p617_p9 }
  0x14   : > { %p625_p0 = pnand %p624_p13, %p618_p10 }
  0x16   : > { %628 = shalt.err (!%p625_p0)
}
  0x17   : > { %s676_s30 = smov [#allocation2]   ;;  %s629_s5 = scalar_lea.vmem %s189_s27, 64 }
  0x18   : > { %564 = dma.vmem_to_smem (!%p742_p6), %s178_s24, 64, %s676_s30, [#allocation3]  }
  0x19   : > { %p630_p1 = scmp.ne.s32.totalorder %s189_s27, %s629_s5  ;;  %p637_p4 = scmp.lt.s32.totalorder %s189_s27, %s189_s27 }
  0x1a   : > { %p638_p3 = scmp.lt.s32.totalorder %s629_s5, %s629_s5 }
  0x1b   : > { %p632_p2 = pnand %p630_p1, %p616_p8 }
  0x1c   : > { %p639_p7 = por %p638_p3, %p637_p4 }
  0x1d   : > { %p633_p5 = pneg %p632_p2 }
  0x1f   : > { %p640_p9 = pnand %p639_p7, %p633_p5 }
  0x21   : > { %643 = shalt.err (!%p640_p9)
}
  0x22   : > { %s677_s6 = smov [#allocation4]   ;;  %p858_p10 = scmp.ne.s32.totalorder %s855_s20, 0 }
  0x23   : > { %567 = dma.vmem_to_smem (!%p742_p6), %s189_s27, 64, %s677_s6, [#allocation5]  }
  0x24   : > { %212 = sbr.rel (%p858_p10) target bundleno = 105 (0x69), region = 36  ;;  %p859_p11 = scmp.ne.s32.totalorder (!%p858_p10), %s856_s21, 0 }
  0x2b   : > { %657 = dma.done.wait (%p859_p11), [#allocation3], 64  }
  0x2c   : > { %659 = vsyncadd (%p859_p11), [#allocation3], 4294967232 }
  0x2d   : > { %661 = dma.done.wait (%p859_p11), [#allocation5], 64  }
  0x2e   : > { %663 = vsyncadd (%p859_p11), [#allocation5], 4294967232 }
  0x2f   : > { %222 = sfence }
  0x30   : > { %p253_p3 = scmp.lt.s32.totalorder %s666_s15, 1  ;;  %s278_s7 = sld [smem:[#allocation2]]  ;;  %v277_v10 = vld [vmem:[%s848_s1] sm:$0x3] }
  0x31   : > { %s524_s8 = sld [smem:[#allocation2 + $0x1]]  ;;  %s525_s9 = sld [smem:[#allocation2 + $0x2]] }
  0x32   : > { %s865_s15 = smov (!%p253_p3, %s666_s15), 1  ;;  %s526_s10 = sld [smem:[#allocation2 + $0x3]] }
  0x33   : > { %s766_s11 = sld [smem:[#allocation4]]  ;;  %s551_s12 = sshll.u32 %s865_s15, 3 }
  0x34   : > { %s528_s13 = sld [smem:[#allocation2 + $0x80]]  ;;  %s260_s20 = scalar_lea.vmem %s847_s0, %s551_s12 }
  0x35   : > { %v774_v0 = vld [vmem:[%s260_s20] sm:$0x3]  ;;  %v776_v1 = vld [vmem:[%s260_s20 + $0x2] sm:$0x3]  ;;  %v778_v2 = vld [vmem:[%s260_s20 + $0x4] sm:$0x3]  ;;  %s272_s14 = scalar_lea.vmem %s851_s4, %s551_s12 }
  0x36   : > { %v279_v3 = vstv %s278_s7  ;;  %v780_v4 = vld [vmem:[%s260_s20 + $0x6] sm:$0x3]  ;;  %s529_s21 = sld [smem:[#allocation2 + $0x81]]  ;;  %s530_s22 = sld [smem:[#allocation2 + $0x82]] }
  0x37   : > { %v280_v5 = vmul.f32 %v279_v3, %v774_v0  ;;  %v282_v6 = vstv %s524_s8  ;;  %v286_v7 = vstv %s525_s9  ;;  %s531_s23 = sld [smem:[#allocation2 + $0x83]]  ;;  %s785_s24 = sld [smem:[#allocation2 + $0x100]] }
  0x38   : > { %v283_v8 = vmul.f32 %v282_v6, %v776_v1  ;;  %v287_v9 = vmul.f32 %v286_v7, %v778_v2  ;;  %v290_v11 = vstv %s526_s10  ;;  %s536_s27 = sld [smem:[#allocation2 + $0x101]]  ;;  %s537_s28 = sld [smem:[#allocation2 + $0x102]] }
  0x39   : > { %v294_v12 = vstv %s766_s11  ;;  %v291_v14 = vmul.f32 %v290_v11, %v780_v4  ;;  %s792_s29 = sld [smem:[#allocation2 + $0x103]]  ;;  %s794_s30 = sld [smem:[#allocation2 + $0x180]] }
  0x3a   : > { %v284_v13 = vadd.f32 %v283_v8, %v280_v5  ;;  %v306_v15 = vstv %s528_s13  ;;  %s796_s5 = sld [smem:[#allocation2 + $0x181]]  ;;  %s798_s6 = sld [smem:[#allocation2 + $0x182]]  ;;  %v295_v17 = vmul.f32 %v294_v12, %v277_v10 }
  0x3b   : > { %v307_v18 = vmul.f32 %v306_v15, %v774_v0  ;;  %s801_s7 = sld [smem:[#allocation2 + $0x183]]  ;;  %s803_s8 = sld [smem:[#allocation4 + $0x80]] }
  0x3c   : > { %v288_v16 = vadd.f32 %v287_v9, %v284_v13  ;;  %v309_v19 = vstv %s529_s21  ;;  %v313_v20 = vstv %s530_s22  ;;  %s805_s9 = sld [smem:[#allocation4 + $0x100]] }
  0x3d   : > { %v310_v22 = vmul.f32 %v309_v19, %v776_v1  ;;  %v314_v23 = vmul.f32 %v313_v20, %v778_v2  ;;  %v317_v24 = vstv %s531_s23  ;;  %s809_s10 = sld [smem:[#allocation4 + $0x180]]  ;;  %v334_v26 = vstv %s785_s24 }
  0x3e   : > { %v292_v21 = vadd.f32 %v291_v14, %v288_v16  ;;  %v318_v25 = vmul.f32 %v317_v24, %v780_v4  ;;  %v337_v27 = vstv %s536_s27  ;;  %v341_v28 = vstv %s537_s28 }
  0x3f   : > { %v311_v30 = vadd.f32 %v310_v22, %v307_v18  ;;  %v335_v31 = vmul.f32 %v334_v26, %v774_v0  ;;  %v338_v32 = vmul.f32 %v337_v27, %v776_v1  ;;  %v342_v33 = vmul.f32 %v341_v28, %v778_v2 }
  0x40   : > { %v296_v29 = vadd.f32 %v295_v17, %v292_v21  ;;  %v345_v34 = vstv %s792_s29  ;;  %v362_v35 = vstv %s794_s30  ;;  %v365_v36 = vstv %s796_s5 }
  0x41   : > { %v315_v38 = vadd.f32 %v314_v23, %v311_v30  ;;  %v339_v39 = vadd.f32 %v338_v32, %v335_v31  ;;  %v346_v40 = vmul.f32 %v345_v34, %v780_v4  ;;  %v363_v41 = vmul.f32 %v362_v35, %v774_v0 }
  0x42   : > { %v527_v37 = vmul.f32 -1.442695, %v296_v29  ;;  %v366_v42 = vmul.f32 %v365_v36, %v776_v1  ;;  %v369_v43 = vstv %s798_s6  ;;  %v373_v44 = vstv %s801_s7 }
  0x43   : > { %v319_v45 = vadd.f32 %v318_v25, %v315_v38  ;;  %v343_v46 = vadd.f32 %v342_v33, %v339_v39  ;;  %v370_v47 = vmul.f32 %v369_v43, %v778_v2  ;;  %v374_v49 = vmul.f32 %v373_v44, %v780_v4 }
  0x44   : > { %598 = vpow2.f32 %v527_v37  ;;  %v367_v48 = vadd.f32 %v366_v42, %v363_v41  ;;  %v321_v50 = vstv %s803_s8  ;;  %v349_v51 = vstv %s805_s9 }
  0x45   : > { %v347_v52 = vadd.f32 %v346_v40, %v343_v46  ;;  %v322_v53 = vmul.f32 %v321_v50, %v277_v10  ;;  %v350_v54 = vmul.f32 %v349_v51, %v277_v10  ;;  %v377_v55 = vstv %s809_s10 }
  0x46   : > { %v371_v56 = vadd.f32 %v370_v47, %v367_v48  ;;  %v378_v57 = vmul.f32 %v377_v55, %v277_v10 }
  0x47   : > { %v323_v58 = vadd.f32 %v322_v53, %v319_v45  ;;  %v351_v59 = vadd.f32 %v350_v54, %v347_v52 }
  0x48   : > { %v375_v60 = vadd.f32 %v374_v49, %v371_v56 }
  0x49   : > { %v533_v61 = vmul.f32 -1.442695, %v323_v58  ;;  %v540_v62 = vmul.f32 -1.442695, %v351_v59 }
  0x4a   : > { %v379_v63 = vadd.f32 %v378_v57, %v375_v60 }
  0x4b   : > { %600 = vpow2.f32 %v533_v61 }
  0x4c   : > { %602 = vpow2.f32 %v540_v62  ;;  %v547_v3 = vmul.f32 -1.442695, %v379_v63 }
  0x4e   : > { %v599_v5 = vpop.eup %598  ;;  %604 = vpow2.f32 %v547_v3 }
  0x4f   : > { %v300_v6 = vadd.f32 1.0, %v599_v5 }
  0x51   : > { %606 = vrcp.f32 %v300_v6 }
  0x55   : > { %v601_v7 = vpop.eup %600 }
  0x56   : > { %v603_v8 = vpop.eup %602  ;;  %v327_v9 = vadd.f32 1.0, %v601_v7 }
  0x57   : > { %v355_v11 = vadd.f32 1.0, %v603_v8 }
  0x58   : > { %v605_v12 = vpop.eup %604  ;;  %608 = vrcp.f32 %v327_v9 }
  0x59   : > { %610 = vrcp.f32 %v355_v11  ;;  %v383_v10 = vadd.f32 1.0, %v605_v12 }
  0x5b   : > { %v607_v13 = vpop.eup %606  ;;  %612 = vrcp.f32 %v383_v10 }
  0x5c   : > { %v303_v14 = vadd.f32 %v607_v13, %v774_v0 }
  0x5e   : > { %304 = vst [vmem:[%s272_s14] sm:$0x3] %v303_v14 }
  0x62   : > { %v609_v15 = vpop.eup %608 }
  0x63   : > { %v611_v16 = vpop.eup %610  ;;  %v330_v17 = vadd.f32 %v609_v15, %v776_v1 }
  0x64   : > { %v358_v18 = vadd.f32 %v611_v16, %v778_v2 }
  0x65   : > { %v613_v19 = vpop.eup %612  ;;  %534 = vst [vmem:[%s272_s14 + $0x2] sm:$0x3] %v330_v17 }
  0x66   : > { %541 = vst [vmem:[%s272_s14 + $0x4] sm:$0x3] %v358_v18  ;;  %v386_v20 = vadd.f32 %v613_v19, %v780_v4 }
  0x68   : > { %548 = vst [vmem:[%s272_s14 + $0x6] sm:$0x3] %v386_v20 }
  0x69 PF: > { %s16_s17 = sadd.s32 1, %s674_s17   ;;  %s860_s15 = smov %s670_s16 }
  0x6a   : > { %p13_p4 = scmp.ge.s32.totalorder %s16_s17, 4   ;;  %s861_s16 = smov %s863_s19 }
  0x6c   :  { %15 = sbr.rel (!%p13_p4) target bundleno = 3 (0x3), region = 81 }
  0x73   :  { %416 = vsyncpa [#allocation3], 1 }
  0x74   :  { %418 = vsyncpa [#allocation3 + $0x1], 1 }
  0x75   :  { %419 = vsyncpa [#allocation5], 1 }

</bundles_post_ra>
